<compile_context>
chip_gen: v5e
topology: v5e:2x2
jax: 0.10.0
libtpu: 0.0.40
codegen_flags: <defaults>
</compile_context>

<pallas_src>
import jax
import jax.numpy as jnp
from jax.experimental import pallas as pl
from jax.experimental.pallas import tpu as pltpu

# Per-block VMEM budget for the fallback path (double-buffered in + out tiles stay
# well under v5e's 16 MiB scoped default and v7x's 64 MiB physical VMEM).
_VMEM_BLOCK_BUDGET = 4 * 1024 * 1024
# How many DMA descriptors to keep in flight on the primary HBM->HBM path.
_TARGET_DMA_CHUNKS = 8


def _cdiv(a, b):
    return -(-a // b)


def _crop_via_hbm_dma(xf, crop, Hc, Wc):
    """Pure HBM->HBM strided-DMA crop.  xf: (NC, H, W) -> (NC, Hc, Wc)."""
    NC, H, W = xf.shape
    itemsize = xf.dtype.itemsize

    # Static cdiv chunking of the flattened (N*C) axis; last chunk may be smaller.
    cb = max(1, _cdiv(NC, _TARGET_DMA_CHUNKS))
    n_chunks = _cdiv(NC, cb)
    chunks = [(k * cb, min(cb, NC - k * cb)) for k in range(n_chunks)]

    def kernel(x_hbm, o_hbm, sems):
        copies = []
        for k, (start, size) in enumerate(chunks):
            cp = pltpu.make_async_copy(
                x_hbm.at[pl.ds(start, size), pl.ds(crop, Hc), pl.ds(crop, Wc)],
                o_hbm.at[pl.ds(start, size)],
                sems.at[k])
            cp.start()
            copies.append(cp)
        for cp in copies:
            cp.wait()

    cost = pl.CostEstimate(flops=0, transcendentals=0,
                           bytes_accessed=2 * NC * Hc * Wc * itemsize)
    return pl.pallas_call(
        kernel,
        out_shape=jax.ShapeDtypeStruct((NC, Hc, Wc), xf.dtype),
        in_specs=[pl.BlockSpec(memory_space=pl.ANY)],
        out_specs=pl.BlockSpec(memory_space=pl.ANY),
        scratch_shapes=[pltpu.SemaphoreType.DMA((n_chunks,))],
        cost_estimate=cost,
    )(xf)


def _crop_via_blockspec(xf, crop, Hc, Wc):
    """Fallback: BlockSpec copy kernel with an in-register crop slice."""
    NC, H, W = xf.shape
    itemsize = xf.dtype.itemsize

    per_c = (H * W + Hc * Wc) * itemsize            # in-block + out-block bytes / channel
    cb = max(1, min(NC, _VMEM_BLOCK_BUDGET // (2 * per_c) or 1))
    grid = (pl.cdiv(NC, cb),)                        # ragged last block: Pallas pads

    def kernel(x_ref, o_ref):
        o_ref[...] = x_ref[:, crop:crop + Hc, crop:crop + Wc]

    vmem_limit = int(min(max(4 * cb * per_c, 16 * 1024 * 1024), 48 * 1024 * 1024))
    cost = pl.CostEstimate(flops=0, transcendentals=0,
                           bytes_accessed=NC * (H * W + Hc * Wc) * itemsize)
    return pl.pallas_call(
        kernel,
        out_shape=jax.ShapeDtypeStruct((NC, Hc, Wc), xf.dtype),
        grid=grid,
        # Last two dims equal the full array dims, so no (8,128)/dtype-packing
        # alignment constraints arise on either spec.
        in_specs=[pl.BlockSpec((cb, H, W), lambda i: (i, 0, 0))],
        out_specs=pl.BlockSpec((cb, Hc, Wc), lambda i: (i, 0, 0)),
        compiler_params=pltpu.CompilerParams(
            dimension_semantics=("parallel",),
            vmem_limit_bytes=vmem_limit),
        cost_estimate=cost,
    )(xf)


def mock_model_forward(x, crop_size):
    """Pallas equivalent of MockModel.forward: x[..., c:-c, c:-c]."""
    N, C, H, W = x.shape
    crop = int(crop_size)
    Hc, Wc = H - 2 * crop, W - 2 * crop
    assert crop > 0 and Hc > 0 and Wc > 0, "crop_size too large for spatial dims"

    xf = x.reshape(N * C, H, W)  # layout plumbing only (row-major, free)

    try:
        out = jax.block_until_ready(_crop_via_hbm_dma(xf, crop, Hc, Wc))
    except Exception:
        # Strided HBM->HBM DMA did not lower / run on this toolchain; use the
        # guaranteed-to-lower BlockSpec copy kernel instead.
        out = jax.block_until_ready(_crop_via_blockspec(xf, crop, Hc, Wc))

    return out.reshape(N, C, Hc, Wc)


if __name__ == "__main__":
    key = jax.random.PRNGKey(0)

    # Small shapes consistent with the forward (module default crop=96 needs
    # >192-pixel inputs; semantics are identical at this scale).
    crop_size = 4
    N, C, H, W = 2, 4, 16, 16
    x = jax.random.normal(key, (N, C, H, W), dtype=jnp.float32)
    out = mock_model_forward(x, crop_size)
    ref = x[..., crop_size:-crop_size, crop_size:-crop_size]
    assert out.shape == ref.shape, out.shape
    assert jnp.array_equal(out, ref), "crop mismatch (case 1)"

    # Second case: NC=3 exercises the ragged cdiv chunking and a crop that is a
    # multiple of the sublane tile.
    crop2, N2, C2, H2, W2 = 8, 1, 3, 32, 48
    x2 = jax.random.normal(jax.random.PRNGKey(0), (N2, C2, H2, W2), dtype=jnp.float32)
    out2 = mock_model_forward(x2, crop2)
    ref2 = x2[..., crop2:-crop2, crop2:-crop2]
    assert out2.shape == ref2.shape, out2.shape
    assert jnp.array_equal(out2, ref2), "crop mismatch (case 2)"

    print("KERNEL_OK")
</pallas_src>

<mosaic_0001>
module attributes {stable_mosaic.version = 11 : i64} {
  func.func @kernel(%arg0: memref<8x16x16xf32, #tpu.memory_space<any>>, %arg1: memref<8x8x8xf32, #tpu.memory_space<any>>, %arg2: memref<8x!tpu.dma_semaphore, #tpu.memory_space<semaphore_mem>>) attributes {dimension_semantics = [], scalar_prefetch = 0 : i64, scratch_operands = 1 : i64, tpu.core_type = #tpu.core_type<tc>} {
    %c0_i32 = arith.constant 0 : i32
    %c0_i32_0 = arith.constant 0 : i32
    %c4_i32 = arith.constant 4 : i32
    %c4_i32_1 = arith.constant 4 : i32
    %0 = tpu.memref_slice %arg0[%c0_i32_0, %c4_i32, %c4_i32_1] : memref<8x16x16xf32, #tpu.memory_space<any>> -> memref<1x8x8xf32, #tpu.memory_space<any>>
    %c0_i32_2 = arith.constant 0 : i32
    %c0_i32_3 = arith.constant 0 : i32
    %c0_i32_4 = arith.constant 0 : i32
    %1 = tpu.memref_slice %arg1[%c0_i32_2, %c0_i32_3, %c0_i32_4] : memref<8x8x8xf32, #tpu.memory_space<any>> -> memref<1x8x8xf32, #tpu.memory_space<any>>
    %2 = tpu.memref_slice %arg2[%c0_i32] : memref<8x!tpu.dma_semaphore, #tpu.memory_space<semaphore_mem>> -> memref<1x!tpu.dma_semaphore, #tpu.memory_space<semaphore_mem>>
    %3 = tpu.memref_squeeze %2 : memref<1x!tpu.dma_semaphore, #tpu.memory_space<semaphore_mem>> -> memref<!tpu.dma_semaphore, #tpu.memory_space<semaphore_mem>>
    tpu.enqueue_dma source(%0 : memref<1x8x8xf32, #tpu.memory_space<any>>) target(%1 : memref<1x8x8xf32, #tpu.memory_space<any>>) target_semaphore(%3 : memref<!tpu.dma_semaphore, #tpu.memory_space<semaphore_mem>>)
    %c1_i32 = arith.constant 1 : i32
    %c1_i32_5 = arith.constant 1 : i32
    %c4_i32_6 = arith.constant 4 : i32
    %c4_i32_7 = arith.constant 4 : i32
    %4 = tpu.memref_slice %arg0[%c1_i32_5, %c4_i32_6, %c4_i32_7] : memref<8x16x16xf32, #tpu.memory_space<any>> -> memref<1x8x8xf32, #tpu.memory_space<any>>
    %c1_i32_8 = arith.constant 1 : i32
    %c0_i32_9 = arith.constant 0 : i32
    %c0_i32_10 = arith.constant 0 : i32
    %5 = tpu.memref_slice %arg1[%c1_i32_8, %c0_i32_9, %c0_i32_10] : memref<8x8x8xf32, #tpu.memory_space<any>> -> memref<1x8x8xf32, #tpu.memory_space<any>>
    %6 = tpu.memref_slice %arg2[%c1_i32] : memref<8x!tpu.dma_semaphore, #tpu.memory_space<semaphore_mem>> -> memref<1x!tpu.dma_semaphore, #tpu.memory_space<semaphore_mem>>
    %7 = tpu.memref_squeeze %6 : memref<1x!tpu.dma_semaphore, #tpu.memory_space<semaphore_mem>> -> memref<!tpu.dma_semaphore, #tpu.memory_space<semaphore_mem>>
    tpu.enqueue_dma source(%4 : memref<1x8x8xf32, #tpu.memory_space<any>>) target(%5 : memref<1x8x8xf32, #tpu.memory_space<any>>) target_semaphore(%7 : memref<!tpu.dma_semaphore, #tpu.memory_space<semaphore_mem>>)
    %c2_i32 = arith.constant 2 : i32
    %c2_i32_11 = arith.constant 2 : i32
    %c4_i32_12 = arith.constant 4 : i32
    %c4_i32_13 = arith.constant 4 : i32
    %8 = tpu.memref_slice %arg0[%c2_i32_11, %c4_i32_12, %c4_i32_13] : memref<8x16x16xf32, #tpu.memory_space<any>> -> memref<1x8x8xf32, #tpu.memory_space<any>>
    %c2_i32_14 = arith.constant 2 : i32
    %c0_i32_15 = arith.constant 0 : i32
    %c0_i32_16 = arith.constant 0 : i32
    %9 = tpu.memref_slice %arg1[%c2_i32_14, %c0_i32_15, %c0_i32_16] : memref<8x8x8xf32, #tpu.memory_space<any>> -> memref<1x8x8xf32, #tpu.memory_space<any>>
    %10 = tpu.memref_slice %arg2[%c2_i32] : memref<8x!tpu.dma_semaphore, #tpu.memory_space<semaphore_mem>> -> memref<1x!tpu.dma_semaphore, #tpu.memory_space<semaphore_mem>>
    %11 = tpu.memref_squeeze %10 : memref<1x!tpu.dma_semaphore, #tpu.memory_space<semaphore_mem>> -> memref<!tpu.dma_semaphore, #tpu.memory_space<semaphore_mem>>
    tpu.enqueue_dma source(%8 : memref<1x8x8xf32, #tpu.memory_space<any>>) target(%9 : memref<1x8x8xf32, #tpu.memory_space<any>>) target_semaphore(%11 : memref<!tpu.dma_semaphore, #tpu.memory_space<semaphore_mem>>)
    %c3_i32 = arith.constant 3 : i32
    %c3_i32_17 = arith.constant 3 : i32
    %c4_i32_18 = arith.constant 4 : i32
    %c4_i32_19 = arith.constant 4 : i32
    %12 = tpu.memref_slice %arg0[%c3_i32_17, %c4_i32_18, %c4_i32_19] : memref<8x16x16xf32, #tpu.memory_space<any>> -> memref<1x8x8xf32, #tpu.memory_space<any>>
    %c3_i32_20 = arith.constant 3 : i32
    %c0_i32_21 = arith.constant 0 : i32
    %c0_i32_22 = arith.constant 0 : i32
    %13 = tpu.memref_slice %arg1[%c3_i32_20, %c0_i32_21, %c0_i32_22] : memref<8x8x8xf32, #tpu.memory_space<any>> -> memref<1x8x8xf32, #tpu.memory_space<any>>
    %14 = tpu.memref_slice %arg2[%c3_i32] : memref<8x!tpu.dma_semaphore, #tpu.memory_space<semaphore_mem>> -> memref<1x!tpu.dma_semaphore, #tpu.memory_space<semaphore_mem>>
    %15 = tpu.memref_squeeze %14 : memref<1x!tpu.dma_semaphore, #tpu.memory_space<semaphore_mem>> -> memref<!tpu.dma_semaphore, #tpu.memory_space<semaphore_mem>>
    tpu.enqueue_dma source(%12 : memref<1x8x8xf32, #tpu.memory_space<any>>) target(%13 : memref<1x8x8xf32, #tpu.memory_space<any>>) target_semaphore(%15 : memref<!tpu.dma_semaphore, #tpu.memory_space<semaphore_mem>>)
    %c4_i32_23 = arith.constant 4 : i32
    %c4_i32_24 = arith.constant 4 : i32
    %c4_i32_25 = arith.constant 4 : i32
    %c4_i32_26 = arith.constant 4 : i32
    %16 = tpu.memref_slice %arg0[%c4_i32_24, %c4_i32_25, %c4_i32_26] : memref<8x16x16xf32, #tpu.memory_space<any>> -> memref<1x8x8xf32, #tpu.memory_space<any>>
    %c4_i32_27 = arith.constant 4 : i32
    %c0_i32_28 = arith.constant 0 : i32
    %c0_i32_29 = arith.constant 0 : i32
    %17 = tpu.memref_slice %arg1[%c4_i32_27, %c0_i32_28, %c0_i32_29] : memref<8x8x8xf32, #tpu.memory_space<any>> -> memref<1x8x8xf32, #tpu.memory_space<any>>
    %18 = tpu.memref_slice %arg2[%c4_i32_23] : memref<8x!tpu.dma_semaphore, #tpu.memory_space<semaphore_mem>> -> memref<1x!tpu.dma_semaphore, #tpu.memory_space<semaphore_mem>>
    %19 = tpu.memref_squeeze %18 : memref<1x!tpu.dma_semaphore, #tpu.memory_space<semaphore_mem>> -> memref<!tpu.dma_semaphore, #tpu.memory_space<semaphore_mem>>
    tpu.enqueue_dma source(%16 : memref<1x8x8xf32, #tpu.memory_space<any>>) target(%17 : memref<1x8x8xf32, #tpu.memory_space<any>>) target_semaphore(%19 : memref<!tpu.dma_semaphore, #tpu.memory_space<semaphore_mem>>)
    %c5_i32 = arith.constant 5 : i32
    %c5_i32_30 = arith.constant 5 : i32
    %c4_i32_31 = arith.constant 4 : i32
    %c4_i32_32 = arith.constant 4 : i32
    %20 = tpu.memref_slice %arg0[%c5_i32_30, %c4_i32_31, %c4_i32_32] : memref<8x16x16xf32, #tpu.memory_space<any>> -> memref<1x8x8xf32, #tpu.memory_space<any>>
    %c5_i32_33 = arith.constant 5 : i32
    %c0_i32_34 = arith.constant 0 : i32
    %c0_i32_35 = arith.constant 0 : i32
    %21 = tpu.memref_slice %arg1[%c5_i32_33, %c0_i32_34, %c0_i32_35] : memref<8x8x8xf32, #tpu.memory_space<any>> -> memref<1x8x8xf32, #tpu.memory_space<any>>
    %22 = tpu.memref_slice %arg2[%c5_i32] : memref<8x!tpu.dma_semaphore, #tpu.memory_space<semaphore_mem>> -> memref<1x!tpu.dma_semaphore, #tpu.memory_space<semaphore_mem>>
    %23 = tpu.memref_squeeze %22 : memref<1x!tpu.dma_semaphore, #tpu.memory_space<semaphore_mem>> -> memref<!tpu.dma_semaphore, #tpu.memory_space<semaphore_mem>>
    tpu.enqueue_dma source(%20 : memref<1x8x8xf32, #tpu.memory_space<any>>) target(%21 : memref<1x8x8xf32, #tpu.memory_space<any>>) target_semaphore(%23 : memref<!tpu.dma_semaphore, #tpu.memory_space<semaphore_mem>>)
    %c6_i32 = arith.constant 6 : i32
    %c6_i32_36 = arith.constant 6 : i32
    %c4_i32_37 = arith.constant 4 : i32
    %c4_i32_38 = arith.constant 4 : i32
    %24 = tpu.memref_slice %arg0[%c6_i32_36, %c4_i32_37, %c4_i32_38] : memref<8x16x16xf32, #tpu.memory_space<any>> -> memref<1x8x8xf32, #tpu.memory_space<any>>
    %c6_i32_39 = arith.constant 6 : i32
    %c0_i32_40 = arith.constant 0 : i32
    %c0_i32_41 = arith.constant 0 : i32
    %25 = tpu.memref_slice %arg1[%c6_i32_39, %c0_i32_40, %c0_i32_41] : memref<8x8x8xf32, #tpu.memory_space<any>> -> memref<1x8x8xf32, #tpu.memory_space<any>>
    %26 = tpu.memref_slice %arg2[%c6_i32] : memref<8x!tpu.dma_semaphore, #tpu.memory_space<semaphore_mem>> -> memref<1x!tpu.dma_semaphore, #tpu.memory_space<semaphore_mem>>
    %27 = tpu.memref_squeeze %26 : memref<1x!tpu.dma_semaphore, #tpu.memory_space<semaphore_mem>> -> memref<!tpu.dma_semaphore, #tpu.memory_space<semaphore_mem>>
    tpu.enqueue_dma source(%24 : memref<1x8x8xf32, #tpu.memory_space<any>>) target(%25 : memref<1x8x8xf32, #tpu.memory_space<any>>) target_semaphore(%27 : memref<!tpu.dma_semaphore, #tpu.memory_space<semaphore_mem>>)
    %c7_i32 = arith.constant 7 : i32
    %c7_i32_42 = arith.constant 7 : i32
    %c4_i32_43 = arith.constant 4 : i32
    %c4_i32_44 = arith.constant 4 : i32
    %28 = tpu.memref_slice %arg0[%c7_i32_42, %c4_i32_43, %c4_i32_44] : memref<8x16x16xf32, #tpu.memory_space<any>> -> memref<1x8x8xf32, #tpu.memory_space<any>>
    %c7_i32_45 = arith.constant 7 : i32
    %c0_i32_46 = arith.constant 0 : i32
    %c0_i32_47 = arith.constant 0 : i32
    %29 = tpu.memref_slice %arg1[%c7_i32_45, %c0_i32_46, %c0_i32_47] : memref<8x8x8xf32, #tpu.memory_space<any>> -> memref<1x8x8xf32, #tpu.memory_space<any>>
    %30 = tpu.memref_slice %arg2[%c7_i32] : memref<8x!tpu.dma_semaphore, #tpu.memory_space<semaphore_mem>> -> memref<1x!tpu.dma_semaphore, #tpu.memory_space<semaphore_mem>>
    %31 = tpu.memref_squeeze %30 : memref<1x!tpu.dma_semaphore, #tpu.memory_space<semaphore_mem>> -> memref<!tpu.dma_semaphore, #tpu.memory_space<semaphore_mem>>
    tpu.enqueue_dma source(%28 : memref<1x8x8xf32, #tpu.memory_space<any>>) target(%29 : memref<1x8x8xf32, #tpu.memory_space<any>>) target_semaphore(%31 : memref<!tpu.dma_semaphore, #tpu.memory_space<semaphore_mem>>)
    %c0_i32_48 = arith.constant 0 : i32
    %c0_i32_49 = arith.constant 0 : i32
    %c4_i32_50 = arith.constant 4 : i32
    %c4_i32_51 = arith.constant 4 : i32
    %32 = tpu.memref_slice %arg0[%c0_i32_49, %c4_i32_50, %c4_i32_51] : memref<8x16x16xf32, #tpu.memory_space<any>> -> memref<1x8x8xf32, #tpu.memory_space<any>>
    %c0_i32_52 = arith.constant 0 : i32
    %c0_i32_53 = arith.constant 0 : i32
    %c0_i32_54 = arith.constant 0 : i32
    %33 = tpu.memref_slice %arg1[%c0_i32_52, %c0_i32_53, %c0_i32_54] : memref<8x8x8xf32, #tpu.memory_space<any>> -> memref<1x8x8xf32, #tpu.memory_space<any>>
    %34 = tpu.memref_slice %arg2[%c0_i32_48] : memref<8x!tpu.dma_semaphore, #tpu.memory_space<semaphore_mem>> -> memref<1x!tpu.dma_semaphore, #tpu.memory_space<semaphore_mem>>
    %35 = tpu.memref_squeeze %34 : memref<1x!tpu.dma_semaphore, #tpu.memory_space<semaphore_mem>> -> memref<!tpu.dma_semaphore, #tpu.memory_space<semaphore_mem>>
    tpu.wait_dma2 semaphore(%35 : memref<!tpu.dma_semaphore, #tpu.memory_space<semaphore_mem>>) src(%32 : memref<1x8x8xf32, #tpu.memory_space<any>>) dst(%33 : memref<1x8x8xf32, #tpu.memory_space<any>>)
    %c1_i32_55 = arith.constant 1 : i32
    %c1_i32_56 = arith.constant 1 : i32
    %c4_i32_57 = arith.constant 4 : i32
    %c4_i32_58 = arith.constant 4 : i32
    %36 = tpu.memref_slice %arg0[%c1_i32_56, %c4_i32_57, %c4_i32_58] : memref<8x16x16xf32, #tpu.memory_space<any>> -> memref<1x8x8xf32, #tpu.memory_space<any>>
    %c1_i32_59 = arith.constant 1 : i32
    %c0_i32_60 = arith.constant 0 : i32
    %c0_i32_61 = arith.constant 0 : i32
    %37 = tpu.memref_slice %arg1[%c1_i32_59, %c0_i32_60, %c0_i32_61] : memref<8x8x8xf32, #tpu.memory_space<any>> -> memref<1x8x8xf32, #tpu.memory_space<any>>
    %38 = tpu.memref_slice %arg2[%c1_i32_55] : memref<8x!tpu.dma_semaphore, #tpu.memory_space<semaphore_mem>> -> memref<1x!tpu.dma_semaphore, #tpu.memory_space<semaphore_mem>>
    %39 = tpu.memref_squeeze %38 : memref<1x!tpu.dma_semaphore, #tpu.memory_space<semaphore_mem>> -> memref<!tpu.dma_semaphore, #tpu.memory_space<semaphore_mem>>
    tpu.wait_dma2 semaphore(%39 : memref<!tpu.dma_semaphore, #tpu.memory_space<semaphore_mem>>) src(%36 : memref<1x8x8xf32, #tpu.memory_space<any>>) dst(%37 : memref<1x8x8xf32, #tpu.memory_space<any>>)
    %c2_i32_62 = arith.constant 2 : i32
    %c2_i32_63 = arith.constant 2 : i32
    %c4_i32_64 = arith.constant 4 : i32
    %c4_i32_65 = arith.constant 4 : i32
    %40 = tpu.memref_slice %arg0[%c2_i32_63, %c4_i32_64, %c4_i32_65] : memref<8x16x16xf32, #tpu.memory_space<any>> -> memref<1x8x8xf32, #tpu.memory_space<any>>
    %c2_i32_66 = arith.constant 2 : i32
    %c0_i32_67 = arith.constant 0 : i32
    %c0_i32_68 = arith.constant 0 : i32
    %41 = tpu.memref_slice %arg1[%c2_i32_66, %c0_i32_67, %c0_i32_68] : memref<8x8x8xf32, #tpu.memory_space<any>> -> memref<1x8x8xf32, #tpu.memory_space<any>>
    %42 = tpu.memref_slice %arg2[%c2_i32_62] : memref<8x!tpu.dma_semaphore, #tpu.memory_space<semaphore_mem>> -> memref<1x!tpu.dma_semaphore, #tpu.memory_space<semaphore_mem>>
    %43 = tpu.memref_squeeze %42 : memref<1x!tpu.dma_semaphore, #tpu.memory_space<semaphore_mem>> -> memref<!tpu.dma_semaphore, #tpu.memory_space<semaphore_mem>>
    tpu.wait_dma2 semaphore(%43 : memref<!tpu.dma_semaphore, #tpu.memory_space<semaphore_mem>>) src(%40 : memref<1x8x8xf32, #tpu.memory_space<any>>) dst(%41 : memref<1x8x8xf32, #tpu.memory_space<any>>)
    %c3_i32_69 = arith.constant 3 : i32
    %c3_i32_70 = arith.constant 3 : i32
    %c4_i32_71 = arith.constant 4 : i32
    %c4_i32_72 = arith.constant 4 : i32
    %44 = tpu.memref_slice %arg0[%c3_i32_70, %c4_i32_71, %c4_i32_72] : memref<8x16x16xf32, #tpu.memory_space<any>> -> memref<1x8x8xf32, #tpu.memory_space<any>>
    %c3_i32_73 = arith.constant 3 : i32
    %c0_i32_74 = arith.constant 0 : i32
    %c0_i32_75 = arith.constant 0 : i32
    %45 = tpu.memref_slice %arg1[%c3_i32_73, %c0_i32_74, %c0_i32_75] : memref<8x8x8xf32, #tpu.memory_space<any>> -> memref<1x8x8xf32, #tpu.memory_space<any>>
    %46 = tpu.memref_slice %arg2[%c3_i32_69] : memref<8x!tpu.dma_semaphore, #tpu.memory_space<semaphore_mem>> -> memref<1x!tpu.dma_semaphore, #tpu.memory_space<semaphore_mem>>
    %47 = tpu.memref_squeeze %46 : memref<1x!tpu.dma_semaphore, #tpu.memory_space<semaphore_mem>> -> memref<!tpu.dma_semaphore, #tpu.memory_space<semaphore_mem>>
    tpu.wait_dma2 semaphore(%47 : memref<!tpu.dma_semaphore, #tpu.memory_space<semaphore_mem>>) src(%44 : memref<1x8x8xf32, #tpu.memory_space<any>>) dst(%45 : memref<1x8x8xf32, #tpu.memory_space<any>>)
    %c4_i32_76 = arith.constant 4 : i32
    %c4_i32_77 = arith.constant 4 : i32
    %c4_i32_78 = arith.constant 4 : i32
    %c4_i32_79 = arith.constant 4 : i32
    %48 = tpu.memref_slice %arg0[%c4_i32_77, %c4_i32_78, %c4_i32_79] : memref<8x16x16xf32, #tpu.memory_space<any>> -> memref<1x8x8xf32, #tpu.memory_space<any>>
    %c4_i32_80 = arith.constant 4 : i32
    %c0_i32_81 = arith.constant 0 : i32
    %c0_i32_82 = arith.constant 0 : i32
    %49 = tpu.memref_slice %arg1[%c4_i32_80, %c0_i32_81, %c0_i32_82] : memref<8x8x8xf32, #tpu.memory_space<any>> -> memref<1x8x8xf32, #tpu.memory_space<any>>
    %50 = tpu.memref_slice %arg2[%c4_i32_76] : memref<8x!tpu.dma_semaphore, #tpu.memory_space<semaphore_mem>> -> memref<1x!tpu.dma_semaphore, #tpu.memory_space<semaphore_mem>>
    %51 = tpu.memref_squeeze %50 : memref<1x!tpu.dma_semaphore, #tpu.memory_space<semaphore_mem>> -> memref<!tpu.dma_semaphore, #tpu.memory_space<semaphore_mem>>
    tpu.wait_dma2 semaphore(%51 : memref<!tpu.dma_semaphore, #tpu.memory_space<semaphore_mem>>) src(%48 : memref<1x8x8xf32, #tpu.memory_space<any>>) dst(%49 : memref<1x8x8xf32, #tpu.memory_space<any>>)
    %c5_i32_83 = arith.constant 5 : i32
    %c5_i32_84 = arith.constant 5 : i32
    %c4_i32_85 = arith.constant 4 : i32
    %c4_i32_86 = arith.constant 4 : i32
    %52 = tpu.memref_slice %arg0[%c5_i32_84, %c4_i32_85, %c4_i32_86] : memref<8x16x16xf32, #tpu.memory_space<any>> -> memref<1x8x8xf32, #tpu.memory_space<any>>
    %c5_i32_87 = arith.constant 5 : i32
    %c0_i32_88 = arith.constant 0 : i32
    %c0_i32_89 = arith.constant 0 : i32
    %53 = tpu.memref_slice %arg1[%c5_i32_87, %c0_i32_88, %c0_i32_89] : memref<8x8x8xf32, #tpu.memory_space<any>> -> memref<1x8x8xf32, #tpu.memory_space<any>>
    %54 = tpu.memref_slice %arg2[%c5_i32_83] : memref<8x!tpu.dma_semaphore, #tpu.memory_space<semaphore_mem>> -> memref<1x!tpu.dma_semaphore, #tpu.memory_space<semaphore_mem>>
    %55 = tpu.memref_squeeze %54 : memref<1x!tpu.dma_semaphore, #tpu.memory_space<semaphore_mem>> -> memref<!tpu.dma_semaphore, #tpu.memory_space<semaphore_mem>>
    tpu.wait_dma2 semaphore(%55 : memref<!tpu.dma_semaphore, #tpu.memory_space<semaphore_mem>>) src(%52 : memref<1x8x8xf32, #tpu.memory_space<any>>) dst(%53 : memref<1x8x8xf32, #tpu.memory_space<any>>)
    %c6_i32_90 = arith.constant 6 : i32
    %c6_i32_91 = arith.constant 6 : i32
    %c4_i32_92 = arith.constant 4 : i32
    %c4_i32_93 = arith.constant 4 : i32
    %56 = tpu.memref_slice %arg0[%c6_i32_91, %c4_i32_92, %c4_i32_93] : memref<8x16x16xf32, #tpu.memory_space<any>> -> memref<1x8x8xf32, #tpu.memory_space<any>>
    %c6_i32_94 = arith.constant 6 : i32
    %c0_i32_95 = arith.constant 0 : i32
    %c0_i32_96 = arith.constant 0 : i32
    %57 = tpu.memref_slice %arg1[%c6_i32_94, %c0_i32_95, %c0_i32_96] : memref<8x8x8xf32, #tpu.memory_space<any>> -> memref<1x8x8xf32, #tpu.memory_space<any>>
    %58 = tpu.memref_slice %arg2[%c6_i32_90] : memref<8x!tpu.dma_semaphore, #tpu.memory_space<semaphore_mem>> -> memref<1x!tpu.dma_semaphore, #tpu.memory_space<semaphore_mem>>
    %59 = tpu.memref_squeeze %58 : memref<1x!tpu.dma_semaphore, #tpu.memory_space<semaphore_mem>> -> memref<!tpu.dma_semaphore, #tpu.memory_space<semaphore_mem>>
    tpu.wait_dma2 semaphore(%59 : memref<!tpu.dma_semaphore, #tpu.memory_space<semaphore_mem>>) src(%56 : memref<1x8x8xf32, #tpu.memory_space<any>>) dst(%57 : memref<1x8x8xf32, #tpu.memory_space<any>>)
    %c7_i32_97 = arith.constant 7 : i32
    %c7_i32_98 = arith.constant 7 : i32
    %c4_i32_99 = arith.constant 4 : i32
    %c4_i32_100 = arith.constant 4 : i32
    %60 = tpu.memref_slice %arg0[%c7_i32_98, %c4_i32_99, %c4_i32_100] : memref<8x16x16xf32, #tpu.memory_space<any>> -> memref<1x8x8xf32, #tpu.memory_space<any>>
    %c7_i32_101 = arith.constant 7 : i32
    %c0_i32_102 = arith.constant 0 : i32
    %c0_i32_103 = arith.constant 0 : i32
    %61 = tpu.memref_slice %arg1[%c7_i32_101, %c0_i32_102, %c0_i32_103] : memref<8x8x8xf32, #tpu.memory_space<any>> -> memref<1x8x8xf32, #tpu.memory_space<any>>
    %62 = tpu.memref_slice %arg2[%c7_i32_97] : memref<8x!tpu.dma_semaphore, #tpu.memory_space<semaphore_mem>> -> memref<1x!tpu.dma_semaphore, #tpu.memory_space<semaphore_mem>>
    %63 = tpu.memref_squeeze %62 : memref<1x!tpu.dma_semaphore, #tpu.memory_space<semaphore_mem>> -> memref<!tpu.dma_semaphore, #tpu.memory_space<semaphore_mem>>
    tpu.wait_dma2 semaphore(%63 : memref<!tpu.dma_semaphore, #tpu.memory_space<semaphore_mem>>) src(%60 : memref<1x8x8xf32, #tpu.memory_space<any>>) dst(%61 : memref<1x8x8xf32, #tpu.memory_space<any>>)
    return
  }
}

module attributes {stable_mosaic.version = 11 : i64} {
  func.func @kernel(%arg0: i32, %arg1: memref<8x16x16xf32, #tpu.memory_space<vmem>>, %arg2: memref<8x8x8xf32, #tpu.memory_space<vmem>>) attributes {dimension_semantics = [#tpu.dimension_semantics<parallel>], iteration_bounds = array<i64: 1>, scalar_prefetch = 0 : i64, scratch_operands = 0 : i64, tpu.core_type = #tpu.core_type<tc>, window_params = [{transform_indices = @transform_0, window_bounds = array<i64: 8, 16, 16>}, {transform_indices = @transform_1, window_bounds = array<i64: 8, 8, 8>}]} {
    %c0 = arith.constant 0 : index
    %c4 = arith.constant 4 : index
    %c4_0 = arith.constant 4 : index
    %0 = vector.load %arg1[%c0, %c4, %c4_0] : memref<8x16x16xf32, #tpu.memory_space<vmem>>, vector<8x8x8xf32>
    %c0_1 = arith.constant 0 : index
    %c0_2 = arith.constant 0 : index
    %c0_3 = arith.constant 0 : index
    %1 = vector.load %arg2[%c0_1, %c0_2, %c0_3] : memref<8x8x8xf32, #tpu.memory_space<vmem>>, vector<8x8x8xf32>
    tpu.vector_store %arg2[%c0_1, %c0_2, %c0_3], %0 {strides = array<i32>} : memref<8x8x8xf32, #tpu.memory_space<vmem>>, vector<8x8x8xf32>,
    return
  }
  func.func @transform_0(%arg0: i32) -> (i32, i32, i32) {
    %c0_i32 = arith.constant 0 : i32
    %c0_i32_0 = arith.constant 0 : i32
    %c0_i32_1 = arith.constant 0 : i32
    return %arg0, %c0_i32, %c0_i32_0 : i32, i32, i32
  }
  func.func @transform_1(%arg0: i32) -> (i32, i32, i32) {
    %c0_i32 = arith.constant 0 : i32
    %c0_i32_0 = arith.constant 0 : i32
    %c0_i32_1 = arith.constant 0 : i32
    return %arg0, %c0_i32, %c0_i32_0 : i32, i32, i32
  }
}

</mosaic_0001>

<bundles_post_ra>
// kernel: tpu_custom_call.1
= control target key start
LH: loop header
LB: loop body
LE: loop exit
PB: predicated region body
PF: predicated region fallthrough
CT: control target
= control target key end

     0   :  { %6 = vsyncpa [#allocation3], 0  ;;  %s185_s0 = inlined_call_operand.hbm [shape: f32[8,16,16], index: 0, kind: input, shape index: {}]   ;;  %s186_s1 = inlined_call_operand.hbm [shape: f32[8,8,8], index: 1, kind: output, shape index: {}]  }
   0x1   :  { %7 = vsyncpa [#allocation4], 0  ;;  %s12_s8 = sshll.u32 %s185_s0, 4  ;;  %s150_s9 = smov [#allocation2]   ;;  %s13_s8 = int_to_ptr.hbm [resolvable:$true] %s12_s8 }
   0x2   :  { %s14_s10 = sshll.u32 %s150_s9, 4  ;;  %s151_s11 = smov 128   ;;  %s15_s10 = int_to_ptr.vmem [resolvable:$true] %s14_s10 }
   0x3   :  { %s152_s12 = smov 8  }
   0x4   :  { %20 = dma.hbm_to_vmem [thread:$0]  %s13_s8, 2048, %s15_s10, [#allocation3], %s151_s11, %s151_s11, %s152_s12  }
   0x5   :  { %146 = dma.done.wait [#allocation3], 2048  }
   0x6   :  { %147 = vsyncadd [#allocation3], 4294965248  ;;  %v27_v0 = vld [vmem:[#allocation2 + $0x24] sm:$0xff]  ;;  %s153_s13 = smov 124   ;;  %v28_v3 = vld [vmem:[#allocation2 + $0x34] sm:$0xff]  ;;  %vm65_vm0 = vcmask 64512  }
   0x7   :  { %v25_v1 = vld [vmem:[#allocation2 + $0x4] sm:$0xff]  ;;  %45 = vrot.lane.b32.xlu1 %v27_v0, %s153_s13  ;;  %v26_v4 = vld [vmem:[#allocation2 + $0x14] sm:$0xff]  ;;  %s154_s0 = smov [#allocation5]   ;;  %s80_s17 = sshll.u32 %s186_s1, 4  ;;  %s81_s17 = int_to_ptr.hbm [resolvable:$true] %s80_s17 }
   0x8   :  { %41 = vrot.lane.b32.xlu0 %v25_v1, %s153_s13  ;;  %v29_v2 = vld [vmem:[#allocation2 + $0x44] sm:$0xff]  ;;  %v30_v5 = vld [vmem:[#allocation2 + $0x54] sm:$0xff]  ;;  %s78_s14 = sshll.u32 %s154_s0, 4  ;;  %s79_s14 = int_to_ptr.vmem [resolvable:$true] %s78_s14 }
   0x9   :  { %49 = vrot.lane.b32.xlu2 %v29_v2, %s153_s13  ;;  %v32_v6 = vld [vmem:[#allocation2 + $0x74] sm:$0xff]  ;;  %v31_v7 = vld [vmem:[#allocation2 + $0x64] sm:$0xff] }
   0xf   :  { %47 = vrot.lane.b32.xlu1 %v28_v3, %s153_s13 }
  0x10   :  { %43 = vrot.lane.b32.xlu0 %v26_v4, %s153_s13 }
  0x11   :  { %51 = vrot.lane.b32.xlu2 %v30_v5, %s153_s13 }
  0x17   :  { %55 = vrot.lane.b32.xlu1 %v32_v6, %s153_s13 }
  0x18   :  { %53 = vrot.lane.b32.xlu0 %v31_v7, %s153_s13 }
  0x63   :  { %v50_v8 = vpop.permute.xlu2 %49 }
  0x64   :  { %70 = vst.msk [vmem:[#allocation5 + $0x20] sm:$0xff] %vm65_vm0, %v50_v8 }
  0x6b   :  { %v52_v9 = vpop.permute.xlu2 %51 }
  0x6c   :  { %71 = vst.msk [vmem:[#allocation5 + $0x28] sm:$0xff] %vm65_vm0, %v52_v9 }
  0x79   :  { %v46_v10 = vpop.permute.xlu1 %45 }
  0x7a   :  { %v42_v11 = vpop.permute.xlu0 %41  ;;  %68 = vst.msk [vmem:[#allocation5 + $0x10] sm:$0xff] %vm65_vm0, %v46_v10 }
  0x7b   :  { %66 = vst.msk [vmem:[#allocation5] sm:$0xff] %vm65_vm0, %v42_v11 }
  0x81   :  { %v48_v12 = vpop.permute.xlu1 %47 }
  0x82   :  { %v44_v13 = vpop.permute.xlu0 %43  ;;  %69 = vst.msk [vmem:[#allocation5 + $0x18] sm:$0xff] %vm65_vm0, %v48_v12 }
  0x83   :  { %67 = vst.msk [vmem:[#allocation5 + $0x8] sm:$0xff] %vm65_vm0, %v44_v13 }
  0x89   :  { %v56_v14 = vpop.permute.xlu1 %55 }
  0x8a   :  { %v54_v15 = vpop.permute.xlu0 %53  ;;  %73 = vst.msk [vmem:[#allocation5 + $0x38] sm:$0xff] %vm65_vm0, %v56_v14 }
  0x8b   :  { %72 = vst.msk [vmem:[#allocation5 + $0x30] sm:$0xff] %vm65_vm0, %v54_v15 }
  0x8c   :  { %86 = dma.vmem_to_hbm [thread:$0]  %s79_s14, 1024, %s81_s17, [#allocation4], %s151_s11, %s151_s11, %s152_s12  }
  0x8d   :  { %148 = dma.done.wait [#allocation4], 1024  }
  0x8e   :  { %149 = vsyncadd [#allocation4], 4294966272 }
  0x8f   :  { %91 = vsyncpa [#allocation3], 1 }
  0x90   :  { %92 = vsyncpa [#allocation4], 1 }

</bundles_post_ra>
